<compile_context>
chip_gen: v6e
topology: v6e:2x2x1
jax: 0.10.0
libtpu: 0.0.40
codegen_flags: <defaults>
</compile_context>

<pallas_src>
import functools

import jax
import jax.numpy as jnp
from jax import lax
from jax.experimental import pallas as pl
from jax.experimental.pallas import tpu as pltpu


def _round_up(x, m):
    return ((x + m - 1) // m) * m


def _pick_tile(total, candidates):
    """Largest candidate that divides `total` (fallback: last candidate)."""
    for c in candidates:
        if total % c == 0:
            return c
    return candidates[-1]


# ----------------------------------------------------------------------------
# Pass 1: tiled GEMM (patches @ W) + per-(M-shard, channel) sum / sum-of-squares.
# Grid = (Cout-tiles [parallel], M-tiles [parallel], K-tiles [arbitrary]).
# ----------------------------------------------------------------------------
def _gemm_stats_kernel(p_ref, w_ref, conv_ref, stats_ref, acc_ref):
    k = pl.program_id(2)          # K-tile index (reduction, innermost)
    n_k = pl.num_programs(2)

    @pl.when(k == 0)
    def _():
        acc_ref[...] = jnp.zeros_like(acc_ref)
        stats_ref[...] = jnp.zeros_like(stats_ref)   # per-(i,j) shard block

    acc_ref[...] += jnp.dot(p_ref[...], w_ref[...],
                            preferred_element_type=jnp.float32)

    @pl.when(k == n_k - 1)
    def _():
        conv = acc_ref[...]                                    # (tm, tn) f32
        conv_ref[...] = conv.astype(conv_ref.dtype)            # bf16 writeback
        # Exact stats from the f32 accumulator; two narrow row stores (no concat).
        stats_ref[0:1, :] = jnp.sum(conv, axis=0, keepdims=True)
        stats_ref[1:2, :] = jnp.sum(conv * conv, axis=0, keepdims=True)


# ----------------------------------------------------------------------------
# Pass 2: per-channel scale/shift (folded BatchNorm with batch stats) + ReLU,
# with the M<->Cout transpose folded in (output layout (N, Cout_pad, OHW_pad)).
# ----------------------------------------------------------------------------
def _bn_relu_t_kernel(x_ref, scale_ref, shift_ref, o_ref, *, use_relu):
    y = x_ref[...].astype(jnp.float32) * scale_ref[0:1, :] + shift_ref[0:1, :]
    if use_relu:
        y = jnp.maximum(y, 0.0)
    # (tm, tn) -> (tn, tm): XLU transpose is free-ish in this memory-bound pass and
    # removes the wrapper-side NHWC->NCHW transpose (a full extra HBM round trip).
    o_ref[0] = jnp.transpose(y, (1, 0)).astype(o_ref.dtype)


# ----------------------------------------------------------------------------
# Glue: im2col (pure data movement) + wrapper.
# ----------------------------------------------------------------------------
def _im2col_nhwc(x_nhwc, kh, kw, stride, padding, dilation):
    N, H, W, C = x_nhwc.shape
    x_pad = jnp.pad(x_nhwc, ((0, 0), (padding, padding), (padding, padding), (0, 0)))
    OH = (H + 2 * padding - dilation * (kh - 1) - 1) // stride + 1
    OW = (W + 2 * padding - dilation * (kw - 1) - 1) // stride + 1
    cols = []
    for i in range(kh):
        for j in range(kw):
            r0 = i * dilation
            c0 = j * dilation
            patch = x_pad[:, r0:r0 + stride * (OH - 1) + 1:stride,
                             c0:c0 + stride * (OW - 1) + 1:stride, :]   # (N, OH, OW, C)
            cols.append(patch)
    patches = jnp.stack(cols, axis=3)                    # (N, OH, OW, KH*KW, C)
    return patches.reshape(N, OH * OW, kh * kw * C), OH, OW


def basic_conv_forward(x_nchw, weight, gamma, beta, *, stride=1, padding=0,
                       dilation=1, relu=True, bn=True, eps=1e-5):
    """BasicConv forward. x_nchw: (N, Cin, H, W); weight: (Cout, Cin, KH, KW)."""
    N, Cin, H, W = x_nchw.shape
    Cout, _, KH, KW = weight.shape

    # NCHW -> NHWC, build im2col patches (glue, not the hot path).
    x_nhwc = jnp.transpose(x_nchw, (0, 2, 3, 1))
    patches, OH, OW = _im2col_nhwc(x_nhwc, KH, KW, stride, padding, dilation)  # (N, OHW, K)
    OHW = OH * OW
    K = patches.shape[-1]

    # (Cout, Cin, KH, KW) -> (KH, KW, Cin, Cout) -> (K, Cout), matching patch col order.
    w_flat = jnp.transpose(weight, (2, 3, 1, 0)).reshape(K, Cout)

    # --- tile / padding choices (zero padding is neutral for conv and stats) ----------
    Cout_pad = _round_up(Cout, 128)
    tn = 256 if Cout_pad % 256 == 0 else 128          # 256-wide MXU tiles on v6e/v7x

    if K <= 1024:
        K_pad = _round_up(K, 16)                      # single full-K block (bf16 sublane)
        tk = K_pad
    else:
        K_pad = _round_up(K, 128)
        tk = _pick_tile(K_pad, (1024, 512, 256, 128))

    # Per-image row padding so pass-2 can index by (image, row-tile) without a transpose.
    OHW_pad = _round_up(OHW, 128)
    tm = _pick_tile(OHW_pad, (512, 256, 128))
    M_pad = N * OHW_pad

    # bf16 MXU inputs (accumulate in f32); padded entries are exact zeros.
    patches_p = jnp.pad(patches.astype(jnp.bfloat16),
                        ((0, 0), (0, OHW_pad - OHW), (0, K_pad - K)))
    patches_p = patches_p.reshape(M_pad, K_pad)
    w_p = jnp.pad(w_flat.astype(jnp.bfloat16),
                  ((0, K_pad - K), (0, Cout_pad - Cout)))

    n_j = Cout_pad // tn
    n_i = M_pad // tm
    n_k = K_pad // tk
    n_mi = OHW_pad // tm          # row tiles per image

    conv_out, stats = pl.pallas_call(
        _gemm_stats_kernel,
        out_shape=(
            jax.ShapeDtypeStruct((M_pad, Cout_pad), jnp.bfloat16),   # bf16 intermediate
            jax.ShapeDtypeStruct((n_i * 8, Cout_pad), jnp.float32),  # per-shard sum/sumsq
        ),
        grid_spec=pltpu.PrefetchScalarGridSpec(
            num_scalar_prefetch=0,
            grid=(n_j, n_i, n_k),
            in_specs=[
                pl.BlockSpec((tm, tk), lambda j, i, k: (i, k)),   # patches
                pl.BlockSpec((tk, tn), lambda j, i, k: (k, j)),   # weight (M-invariant)
            ],
            out_specs=(
                pl.BlockSpec((tm, tn), lambda j, i, k: (i, j)),   # conv output (k-resident)
                pl.BlockSpec((8, tn), lambda j, i, k: (i, j)),    # per-shard stats block
            ),
            scratch_shapes=[pltpu.VMEM((tm, tn), jnp.float32)],
        ),
        compiler_params=pltpu.CompilerParams(
            dimension_semantics=("parallel", "parallel", "arbitrary")),
    )(patches_p, w_p)

    # Reduce per-M-shard partial stats, fold BatchNorm (training-mode batch stats) into
    # per-channel scale/shift.  Padded rows/channels are exactly zero, so dividing by the
    # true element count keeps the stats exact; padded channels get scale=shift=0 (no NaN).
    if bn:
        st = stats.reshape(n_i, 8, Cout_pad)
        sum_c = jnp.sum(st[:, 0, :], axis=0)
        sumsq_c = jnp.sum(st[:, 1, :], axis=0)
        gamma_p = jnp.pad(gamma.astype(jnp.float32), (0, Cout_pad - Cout))
        beta_p = jnp.pad(beta.astype(jnp.float32), (0, Cout_pad - Cout))
        m_true = jnp.float32(N * OHW)
        mean = sum_c / m_true
        var = jnp.maximum(sumsq_c / m_true - mean * mean, 0.0)   # clamp E[x^2]-mean^2
        scale = gamma_p * lax.rsqrt(var + eps)
        shift = beta_p - mean * scale
    else:
        scale = jnp.ones((Cout_pad,), jnp.float32)
        shift = jnp.zeros((Cout_pad,), jnp.float32)

    scale8 = jnp.broadcast_to(scale[None, :], (8, Cout_pad))
    shift8 = jnp.broadcast_to(shift[None, :], (8, Cout_pad))

    out_pad = pl.pallas_call(
        functools.partial(_bn_relu_t_kernel, use_relu=relu),
        out_shape=jax.ShapeDtypeStruct((N, Cout_pad, OHW_pad), jnp.float32),
        grid_spec=pltpu.PrefetchScalarGridSpec(
            num_scalar_prefetch=0,
            grid=(N, n_mi, n_j),
            in_specs=[
                pl.BlockSpec((tm, tn), lambda n, mi, j: (n * n_mi + mi, j)),  # conv tile
                pl.BlockSpec((8, tn), lambda n, mi, j: (0, j)),               # scale
                pl.BlockSpec((8, tn), lambda n, mi, j: (0, j)),               # shift
            ],
            out_specs=pl.BlockSpec((1, tn, tm), lambda n, mi, j: (n, j, mi)),
        ),
        compiler_params=pltpu.CompilerParams(
            dimension_semantics=("parallel", "parallel", "parallel")),
    )(conv_out, scale8, shift8)

    # Output is already channel-major: just strip padding and reshape to NCHW.
    return out_pad[:, :Cout, :OHW].reshape(N, Cout, OH, OW)


# ----------------------------------------------------------------------------
# Plain-JAX reference (loose sanity check; kernel uses bf16 MXU inputs).
# ----------------------------------------------------------------------------
def _reference_forward(x, weight, gamma, beta, *, stride, padding, dilation,
                       relu, bn, eps):
    y = lax.conv_general_dilated(
        x, weight, window_strides=(stride, stride),
        padding=[(padding, padding), (padding, padding)],
        rhs_dilation=(dilation, dilation),
        dimension_numbers=("NCHW", "OIHW", "NCHW"))
    if bn:
        mean = jnp.mean(y, axis=(0, 2, 3), keepdims=True)
        var = jnp.mean((y - mean) ** 2, axis=(0, 2, 3), keepdims=True)
        y = (y - mean) * lax.rsqrt(var + eps) * gamma.reshape(1, -1, 1, 1) \
            + beta.reshape(1, -1, 1, 1)
    if relu:
        y = jnp.maximum(y, 0.0)
    return y


if __name__ == "__main__":
    # BasicConv(in_planes=4, out_planes=8, kernel_size=3, stride=1, padding=1,
    #           relu=True, bn=True, bias=False)
    key = jax.random.PRNGKey(0)
    kx, kw_, kg, kb = jax.random.split(key, 4)

    N, Cin, H, W = 2, 4, 16, 16
    Cout, KH, KW = 8, 3, 3

    x = jax.random.normal(kx, (N, Cin, H, W), dtype=jnp.float32)
    weight = 0.1 * jax.random.normal(kw_, (Cout, Cin, KH, KW), dtype=jnp.float32)
    gamma = 1.0 + 0.05 * jax.random.normal(kg, (Cout,), dtype=jnp.float32)
    beta = 0.05 * jax.random.normal(kb, (Cout,), dtype=jnp.float32)

    y = basic_conv_forward(x, weight, gamma, beta, stride=1, padding=1,
                           dilation=1, relu=True, bn=True)
    y = jax.block_until_ready(y)
    assert y.shape == (N, Cout, H, W), y.shape

    y_ref = _reference_forward(x, weight, gamma, beta, stride=1, padding=1,
                               dilation=1, relu=True, bn=True, eps=1e-5)
    err = float(jnp.max(jnp.abs(y - y_ref)))
    assert err < 0.1, f"max abs err {err}"

    print("KERNEL_OK")
</pallas_src>

<mosaic_0001>
module attributes {stable_mosaic.version = 11 : i64} {
  func.func @_gemm_stats_kernel(%arg0: i32, %arg1: i32, %arg2: i32, %arg3: memref<256x48xbf16, #tpu.memory_space<vmem>>, %arg4: memref<48x128xbf16, #tpu.memory_space<vmem>>, %arg5: memref<256x128xbf16, #tpu.memory_space<vmem>>, %arg6: memref<8x128xf32, #tpu.memory_space<vmem>>, %arg7: memref<256x128xf32, #tpu.memory_space<vmem>>) attributes {dimension_semantics = [#tpu.dimension_semantics<parallel>, #tpu.dimension_semantics<parallel>, #tpu.dimension_semantics<arbitrary>], iteration_bounds = array<i64: 1, 2, 1>, scalar_prefetch = 0 : i64, scratch_operands = 1 : i64, tpu.core_type = #tpu.core_type<tc>, window_params = [{transform_indices = @transform_0, window_bounds = array<i64: 256, 48>}, {transform_indices = @transform_1, window_bounds = array<i64: 48, 128>}, {transform_indices = @transform_2, window_bounds = array<i64: 256, 128>}, {transform_indices = @transform_3, window_bounds = array<i64: 8, 128>}]} {
    %c0_i32 = arith.constant 0 : i32
    %0 = arith.cmpi eq, %arg2, %c0_i32 : i32
    %1 = arith.extui %0 : i1 to i32
    %c0_i32_0 = arith.constant 0 : i32
    %2 = arith.cmpi ne, %1, %c0_i32_0 : i32
    scf.if %2 {
      %cst_10 = arith.constant 0.000000e+00 : f32
      %12 = vector.broadcast %cst_10 : f32 to vector<256x128xf32>
      %c0_11 = arith.constant 0 : index
      %c0_12 = arith.constant 0 : index
      %13 = vector.load %arg7[%c0_11, %c0_12] : memref<256x128xf32, #tpu.memory_space<vmem>>, vector<256x128xf32>
      tpu.vector_store %arg7[%c0_11, %c0_12], %12 {strides = array<i32>} : memref<256x128xf32, #tpu.memory_space<vmem>>, vector<256x128xf32>,
      %cst_13 = arith.constant 0.000000e+00 : f32
      %14 = vector.broadcast %cst_13 : f32 to vector<8x128xf32>
      %c0_14 = arith.constant 0 : index
      %c0_15 = arith.constant 0 : index
      %15 = vector.load %arg6[%c0_14, %c0_15] : memref<8x128xf32, #tpu.memory_space<vmem>>, vector<8x128xf32>
      tpu.vector_store %arg6[%c0_14, %c0_15], %14 {strides = array<i32>} : memref<8x128xf32, #tpu.memory_space<vmem>>, vector<8x128xf32>,
    } else {
    }
    %c0 = arith.constant 0 : index
    %c0_1 = arith.constant 0 : index
    %3 = vector.load %arg7[%c0, %c0_1] : memref<256x128xf32, #tpu.memory_space<vmem>>, vector<256x128xf32>
    %c0_2 = arith.constant 0 : index
    %c0_3 = arith.constant 0 : index
    %4 = vector.load %arg3[%c0_2, %c0_3] : memref<256x48xbf16, #tpu.memory_space<vmem>>, vector<256x48xbf16>
    %c0_4 = arith.constant 0 : index
    %c0_5 = arith.constant 0 : index
    %5 = vector.load %arg4[%c0_4, %c0_5] : memref<48x128xbf16, #tpu.memory_space<vmem>>, vector<48x128xbf16>
    %cst = arith.constant dense<0.000000e+00> : vector<256x128xf32>
    %6 = tpu.matmul %4, %5, %cst {dimension_numbers = #tpu.dot_dimension_numbers<[1], [0], [0], [1], [0, 0, 1, 1], [], []>} : vector<256x48xbf16>, vector<48x128xbf16>, vector<256x128xf32> -> vector<256x128xf32>
    %7 = arith.addf %3, %6 : vector<256x128xf32>
    %c0_6 = arith.constant 0 : index
    %c0_7 = arith.constant 0 : index
    %8 = vector.load %arg7[%c0_6, %c0_7] : memref<256x128xf32, #tpu.memory_space<vmem>>, vector<256x128xf32>
    tpu.vector_store %arg7[%c0_6, %c0_7], %7 {strides = array<i32>} : memref<256x128xf32, #tpu.memory_space<vmem>>, vector<256x128xf32>,
    %c0_i32_8 = arith.constant 0 : i32
    %9 = arith.cmpi eq, %arg2, %c0_i32_8 : i32
    %10 = arith.extui %9 : i1 to i32
    %c0_i32_9 = arith.constant 0 : i32
    %11 = arith.cmpi ne, %10, %c0_i32_9 : i32
    scf.if %11 {
      %c0_10 = arith.constant 0 : index
      %c0_11 = arith.constant 0 : index
      %12 = vector.load %arg7[%c0_10, %c0_11] : memref<256x128xf32, #tpu.memory_space<vmem>>, vector<256x128xf32>
      %13 = arith.truncf %12 : vector<256x128xf32> to vector<256x128xbf16>
      %c0_12 = arith.constant 0 : index
      %c0_13 = arith.constant 0 : index
      %14 = vector.load %arg5[%c0_12, %c0_13] : memref<256x128xbf16, #tpu.memory_space<vmem>>, vector<256x128xbf16>
      tpu.vector_store %arg5[%c0_12, %c0_13], %13 {strides = array<i32>} : memref<256x128xbf16, #tpu.memory_space<vmem>>, vector<256x128xbf16>,
      %cst_14 = arith.constant dense<0.000000e+00> : vector<128xf32>
      %15 = vector.multi_reduction <add>, %12, %cst_14 [0] : vector<256x128xf32> to vector<128xf32>
      %16 = vector.shape_cast %15 : vector<128xf32> to vector<1x128xf32>
      %c0_15 = arith.constant 0 : index
      %c0_16 = arith.constant 0 : index
      %17 = vector.load %arg6[%c0_15, %c0_16] : memref<8x128xf32, #tpu.memory_space<vmem>>, vector<1x128xf32>
      tpu.vector_store %arg6[%c0_15, %c0_16], %16 {strides = array<i32>} : memref<8x128xf32, #tpu.memory_space<vmem>>, vector<1x128xf32>,
      %18 = arith.mulf %12, %12 : vector<256x128xf32>
      %cst_17 = arith.constant dense<0.000000e+00> : vector<128xf32>
      %19 = vector.multi_reduction <add>, %18, %cst_17 [0] : vector<256x128xf32> to vector<128xf32>
      %20 = vector.shape_cast %19 : vector<128xf32> to vector<1x128xf32>
      %c1 = arith.constant 1 : index
      %c0_18 = arith.constant 0 : index
      %21 = vector.load %arg6[%c1, %c0_18] : memref<8x128xf32, #tpu.memory_space<vmem>>, vector<1x128xf32>
      tpu.vector_store %arg6[%c1, %c0_18], %20 {strides = array<i32>} : memref<8x128xf32, #tpu.memory_space<vmem>>, vector<1x128xf32>,
    } else {
    }
    return
  }
  func.func @transform_0(%arg0: i32, %arg1: i32, %arg2: i32) -> (i32, i32) {
    %c0_i32 = arith.constant 0 : i32
    return %arg1, %arg2 : i32, i32
  }
  func.func @transform_1(%arg0: i32, %arg1: i32, %arg2: i32) -> (i32, i32) {
    %c0_i32 = arith.constant 0 : i32
    return %arg2, %arg0 : i32, i32
  }
  func.func @transform_2(%arg0: i32, %arg1: i32, %arg2: i32) -> (i32, i32) {
    %c0_i32 = arith.constant 0 : i32
    return %arg1, %arg0 : i32, i32
  }
  func.func @transform_3(%arg0: i32, %arg1: i32, %arg2: i32) -> (i32, i32) {
    %c0_i32 = arith.constant 0 : i32
    return %arg1, %arg0 : i32, i32
  }
}

</mosaic_0001>

<bundles_post_ra>
// kernel: tpu_custom_call.1
= control target key start
LH: loop header
LB: loop body
LE: loop exit
PB: predicated region body
PF: predicated region fallthrough
CT: control target
= control target key end

     0   :  { %9 = vsyncpa [#allocation4], 0  ;;  %s1984_s0 = inlined_call_operand.vmem [shape: bf16[512,48], index: 0, kind: input, shape index: {}]   ;;  %s1985_s1 = inlined_call_operand.vmem [shape: bf16[48,128], index: 1, kind: input, shape index: {}]   ;;  %s1986_s2 = inlined_call_operand.hbm [shape: bf16[512,128], index: 2, kind: output, shape index: {0}]   ;;  %s1987_s3 = inlined_call_operand.hbm [shape: f32[16,128], index: 3, kind: output, shape index: {1}]  }
   0x1   :  { %11 = vsyncpa [#allocation4 + $0x1], 0 }
   0x2   :  { %12 = vsyncpa [#allocation6], 0 }
   0x3   :  { %14 = vsyncpa [#allocation6 + $0x1], 0  ;;  %s1686_s12 = smov 0   ;;  %s1688_s13 = smov 0  }
   0x4   :  { %s1690_s14 = smov 0   ;;  %s1692_s15 = smov 0  }
   0x5   :  { %s1694_s16 = smov 0   ;;  %s1696_s17 = smov 0  }
   0x6 LB: > { %s1196_s18 = sadd.s32 4294967295, %s1659_s17   ;;  %s1197_s19 = sadd.s32 4294967294, %s1659_s17   ;;  %s1659_s17 = sphi %s1696_s17, %s20_s17   ;;  %s1655_s16 = sphi %s1694_s16, %s1994_s16   ;;  %s1651_s15 = sphi %s1692_s15, %s1993_s15   ;;  %s1647_s14 = sphi %s1690_s14, %s1992_s14   ;;  %s1643_s13 = sphi %s1688_s13, %s1991_s13   ;;  %s1639_s12 = sphi %s1686_s12, %s1990_s12  }
   0x7   : > { %s35_s20 = sadd.s32 1, %s1655_s16  ;;  %s104_s21 = sadd.s32 1, %s1647_s14 }
   0x8   : > { %p37_p0 = scmp.ge.s32.totalorder %s35_s20, 2  ;;  %p114_p1 = scmp.ne.s32.totalorder %s1647_s14, %s1643_s13 }
   0x9   : > { %p115_p2 = scmp.eq.s32.totalorder %s1196_s18, 1  ;;  %p120_p3 = scmp.ne.s32.totalorder %s1643_s13, %s1639_s12 }
   0xa   : > { %s1996_s20 = smov (%p37_p0, %s35_s20), 0  ;;  %p121_p5 = scmp.eq.s32.totalorder %s1197_s19, 1 }
   0xb   : > { %p1726_p4 = por %p115_p2, %p114_p1  ;;  %s99_s23 = ssub.s32 %s1655_s16, %s1996_s20 }
   0xc   : > { %p1201_p6 = scmp.ge.s32.totalorder %s1659_s17, 1  ;;  %p102_p7 = scmp.eq.s32.totalorder %s99_s23, 0 }
   0xd   : > { %p1733_p8 = por %p121_p5, %p120_p3  ;;  %p191_p9 = scmp.lt.s32.totalorder %s1659_s17, 3 }
   0xe   : > { %s1739_s25 = scalar_select %p102_p7, %s1647_s14, %s104_s21  }
   0xf   : > { %p192_p10 = pnand %p1201_p6, %p191_p9 }
  0x10   : > { %s1204_s28 = sshll.u32 (!%p192_p10), %s1651_s15, 5  ;;  %s1789_s10 = sand.u32 (!%p192_p10), 1, %s1643_s13  }
  0x11   : > { %195 = sbr.rel (%p192_p10) target bundleno = 333 (0x14d), region = 28  ;;  %p232_p11 = scmp.lt.s32.totalorder (!%p192_p10), %s1204_s28, 63 }
  0x12   : > { %s1203_s11 = sshll.u32 (!%p192_p10), %s1789_s10, 3  ;;  %s1202_s19 = sshll.u32 (!%p192_p10), %s1789_s10, 7 }
  0x13   : > { %s1792_s18 = scalar_lea.vmem (!%p192_p10), [#allocation5], %s1203_s11  ;;  %s1800_s21 = scalar_lea.vmem (!%p192_p10), [#allocation3], %s1202_s19 }
  0x14   : > { %s1312_s23 = sshll.u32 (!%p192_p10), %s1651_s15, 11  ;;  %s1053_s26 = sshll.u32 (!%p192_p10), %s1800_s21, 4  ;;  %s1865_s26 = int_to_ptr.vmem [resolvable:$true] %s1053_s26 }
  0x15   : > { %s1863_s29 = scalar_lea.hbm (!%p192_p10), %s1986_s2, %s1312_s23  ;;  %s1034_s30 = scalar_lea.sflag (!%p192_p10), [#allocation4], %s1789_s10 }
  0x16   : > { %v1534_v0 = vld [vmem:[%s1985_s1 + $0x10] sm:$0xff]   ;;  %v1535_v1 = vld [vmem:[%s1985_s1 + $0x8] sm:$0xff]   ;;  %s1998_s28 = smov (!%p232_p11, %s1204_s28), 63  ;;  %v1536_v2 = vld [vmem:[%s1985_s1] sm:$0xff]   ;;  %vm456_vm0 = vcmask 392192   ;;  %v1661_v19 = vmov 0.0  }
  0x17   : > { %1427 = vmatprep.subr.bf16.mxu0 %v1534_v0  ;;  %1465 = vmatprep.subr.bf16.mxu1 %v1534_v0  ;;  %s1205_s6 = sshll.u32 %s1998_s28, 2  ;;  %287 = vst [vmem:[%s1792_s18] sm:$0xff] %v1661_v19  ;;  %s1553_s4 = scalar_lea.vmem %s1865_s26, 2048 }
  0x18   : > { %1428 = vmatpush3.bf16.msra.mxu0 %v1534_v0  ;;  %1468 = vmatpush3.bf16.msra.mxu1 %v1534_v0  ;;  %s1754_s9 = scalar_lea.vmem %s1984_s0, %s1205_s6  ;;  %p1554_p12 = scmp.ne.s32.totalorder %s1865_s26, %s1553_s4 }
  0x19   : > { %1429 = vmatprep.subr.bf16.mxu0 %v1535_v1  ;;  %1466 = vmatprep.subr.bf16.mxu1 %v1535_v1  ;;  %v1537_v3 = vld [vmem:[%s1754_s9] sm:$0xff]   ;;  %v1538_v4 = vld [vmem:[%s1754_s9 + $0x8] sm:$0xff]   ;;  %v1539_v5 = vld [vmem:[%s1754_s9 + $0x10] sm:$0xff]   ;;  %s1662_s5 = smov [#allocation3]  }
  0x1a   : > { %1433 = vmatprep.mubr.msk.bf16.mxu0 %vm456_vm0, %v1537_v3  ;;  %v1545_v6 = vld [vmem:[%s1754_s9 + $0x40] sm:$0xff]   ;;  %v1546_v7 = vld [vmem:[%s1754_s9 + $0x48] sm:$0xff]   ;;  %v1547_v8 = vld [vmem:[%s1754_s9 + $0x50] sm:$0xff]   ;;  %p1555_p13 = pnand %p1554_p12, %p1726_p4  ;;  %s1557_s6 = sshll.u32 %s1662_s5, 4  ;;  %s1558_s6 = int_to_ptr.vmem [resolvable:$false] %s1557_s6 }
  0x1b   : > { %1449 = vmatprep.mubr.msk.bf16.mxu1 %vm456_vm0, %v1545_v6  ;;  %v1540_v9 = vld [vmem:[%s1754_s9 + $0x18] sm:$0xff]   ;;  %v1541_v10 = vld [vmem:[%s1754_s9 + $0x20] sm:$0xff]   ;;  %v1542_v13 = vld [vmem:[%s1754_s9 + $0x28] sm:$0xff]   ;;  %s1559_s7 = scalar_lea.vmem %s1558_s6, 4096  ;;  %p1560_p1 = scmp.lt.s32.totalorder %s1865_s26, %s1558_s6 }
  0x1c   : > { %1430 = vmatpush3.bf16.msra.mxu0 %v1535_v1  ;;  %1469 = vmatpush3.bf16.msra.mxu1 %v1535_v1  ;;  %v1548_v11 = vld [vmem:[%s1754_s9 + $0x58] sm:$0xff]   ;;  %v1549_v12 = vld [vmem:[%s1754_s9 + $0x60] sm:$0xff]   ;;  %v1543_v14 = vld [vmem:[%s1754_s9 + $0x30] sm:$0xff]   ;;  %p1556_p0 = pneg %p1555_p13  ;;  %p1561_p2 = scmp.lt.s32.totalorder %s1559_s7, %s1553_s4 }
  0x1d   : > { %1431 = vmatprep.subr.bf16.mxu0 %v1536_v2  ;;  %1467 = vmatprep.subr.bf16.mxu1 %v1536_v2  ;;  %v1550_v15 = vld [vmem:[%s1754_s9 + $0x68] sm:$0xff]   ;;  %v1551_v16 = vld [vmem:[%s1754_s9 + $0x70] sm:$0xff]   ;;  %v1544_v17 = vld [vmem:[%s1754_s9 + $0x38] sm:$0xff]  }
  0x1e   : > { %v1552_v18 = vld [vmem:[%s1754_s9 + $0x78] sm:$0xff]   ;;  %p1562_p3 = por %p1561_p2, %p1560_p1 }
  0x20   : > { %1432 = vmatpush3.bf16.msra.mxu0 %v1536_v2  ;;  %1470 = vmatpush3.bf16.msra.mxu1 %v1536_v2  ;;  %p1563_p5 = pnand %p1562_p3, %p1556_p0 }
  0x23   : > { %1434 = vmatmul.mubr.msk.bf16.vlgmr.msra.gmra.mxu0 %vm456_vm0, %v1538_v4  ;;  %1450 = vmatmul.mubr.msk.bf16.vlgmr.msra.gmra.mxu1 %vm456_vm0, %v1546_v7 }
  0x24   : > { %1437 = vmatprep.mubr.msk.bf16.mxu0 %vm456_vm0, %v1539_v5  ;;  %1453 = vmatprep.mubr.msk.bf16.mxu1 %vm456_vm0, %v1547_v8 }
  0x2b   : > { %1438 = vmatmul.mubr.msk.bf16.gmra.mxu0 %vm456_vm0, %v1540_v9  ;;  %1454 = vmatmul.mubr.msk.bf16.gmra.mxu1 %vm456_vm0, %v1548_v11 }
  0x2c   : > { %1441 = vmatprep.mubr.msk.bf16.mxu0 %vm456_vm0, %v1541_v10  ;;  %1457 = vmatprep.mubr.msk.bf16.mxu1 %vm456_vm0, %v1549_v12 }
  0x33   : > { %1442 = vmatmul.mubr.msk.bf16.gmra.mxu0 %vm456_vm0, %v1542_v13  ;;  %1458 = vmatmul.mubr.msk.bf16.gmra.mxu1 %vm456_vm0, %v1550_v15 }
  0x34   : > { %1445 = vmatprep.mubr.msk.bf16.mxu0 %vm456_vm0, %v1543_v14  ;;  %1461 = vmatprep.mubr.msk.bf16.mxu1 %vm456_vm0, %v1551_v16 }
  0x3b   : > { %1446 = vmatmul.mubr.msk.bf16.gmra.mxu0 %vm456_vm0, %v1544_v17  ;;  %1462 = vmatmul.mubr.msk.bf16.gmra.mxu1 %vm456_vm0, %v1552_v18 }
  0xe3   : > { %v1435_v20 = vpop.f32.mrf.mxu0  ;;  %v1796_v23 = vpop.f32.mrf.mxu1 }
  0xe4   : > { %v965_v33 = vmul.f32 %v1435_v20, %v1435_v20 }
  0xe5   : > { %v539_v21 = vpop.f32.mrf.mxu0  ;;  %v1798_v26 = vpop.f32.mrf.mxu1 }
  0xe6   : > { %v963_v27 = vmul.f32 %v539_v21, %v539_v21 }
  0xe7   : > { %v1436_v22 = vpop.f32.mrf.mxu0  ;;  %v1803_v32 = vpop.f32.mrf.mxu1 }
  0xe8   : > { %v1321_v24 = vpack.c.bf16 %v1436_v22, %v1435_v20  ;;  %v1361_v36 = vpack.c.bf16 %v1803_v32, %v1796_v23  ;;  %v966_v39 = vmul.f32 %v1436_v22, %v1436_v22 }
  0xe9   : > { %v542_v25 = vpop.f32.mrf.mxu0  ;;  %v1808_v38 = vpop.f32.mrf.mxu1 }
  0xea   : > { %1393 = vst [vmem:[%s1800_s21 + $0x8] sm:$0xff] %v1321_v24   ;;  %v1316_v28 = vpack.c.bf16 %v542_v25, %v539_v21  ;;  %v925_v29 = vadd.f32 %v542_v25, %v539_v21  ;;  %v964_v30 = vmul.f32 %v542_v25, %v542_v25  ;;  %1401 = vst [vmem:[%s1800_s21 + $0x48] sm:$0xff] %v1361_v36  }
  0xeb   : > { %v1439_v31 = vpop.f32.mrf.mxu0  ;;  %v1356_v42 = vpack.c.bf16 %v1808_v38, %v1798_v26  ;;  %v1813_v44 = vpop.f32.mrf.mxu1 }
  0xec   : > { %1317 = vst [vmem:[%s1800_s21] sm:$0xff] %v1316_v28   ;;  %v926_v34 = vadd.f32 %v1435_v20, %v925_v29  ;;  %v995_v35 = vadd.f32 %v964_v30, %v963_v27  ;;  %v969_v57 = vmul.f32 %v1439_v31, %v1439_v31 }
  0xed   : > { %v555_v37 = vpop.f32.mrf.mxu0  ;;  %1400 = vst [vmem:[%s1800_s21 + $0x40] sm:$0xff] %v1356_v42   ;;  %v1816_v50 = vpop.f32.mrf.mxu1 }
  0xee   : > { %v996_v40 = vadd.f32 %v995_v35, %v965_v33  ;;  %v927_v41 = vadd.f32 %v1436_v22, %v926_v34  ;;  %v967_v46 = vmul.f32 %v555_v37, %v555_v37 }
  0xef   : > { %v1440_v43 = vpop.f32.mrf.mxu0  ;;  %v1819_v56 = vpop.f32.mrf.mxu1 }
  0xf0   : > { %v928_v45 = vadd.f32 %v927_v41, %v555_v37  ;;  %v997_v47 = vadd.f32 %v996_v40, %v966_v39  ;;  %v1331_v48 = vpack.c.bf16 %v1440_v43, %v1439_v31  ;;  %v1371_v60 = vpack.c.bf16 %v1819_v56, %v1813_v44 }
  0xf1   : > { %v558_v49 = vpop.f32.mrf.mxu0  ;;  %v1824_v62 = vpop.f32.mrf.mxu1  ;;  %v970_v63 = vmul.f32 %v1440_v43, %v1440_v43 }
  0xf2   : > { %v998_v51 = vadd.f32 %v997_v47, %v967_v46  ;;  %1395 = vst [vmem:[%s1800_s21 + $0x18] sm:$0xff] %v1331_v48   ;;  %v1326_v52 = vpack.c.bf16 %v558_v49, %v555_v37  ;;  %v929_v53 = vadd.f32 %v928_v45, %v558_v49  ;;  %v968_v54 = vmul.f32 %v558_v49, %v558_v49 }
  0xf3   : > { %v1443_v55 = vpop.f32.mrf.mxu0  ;;  %1403 = vst [vmem:[%s1800_s21 + $0x58] sm:$0xff] %v1371_v60   ;;  %v1366_v2 = vpack.c.bf16 %v1824_v62, %v1816_v50  ;;  %v1829_v4 = vpop.f32.mrf.mxu1 }
  0xf4   : > { %1394 = vst [vmem:[%s1800_s21 + $0x10] sm:$0xff] %v1326_v52   ;;  %v930_v58 = vadd.f32 %v1439_v31, %v929_v53  ;;  %v999_v59 = vadd.f32 %v998_v51, %v968_v54  ;;  %v973_v17 = vmul.f32 %v1443_v55, %v1443_v55 }
  0xf5   : > { %v571_v61 = vpop.f32.mrf.mxu0  ;;  %1402 = vst [vmem:[%s1800_s21 + $0x50] sm:$0xff] %v1366_v2   ;;  %v1832_v10 = vpop.f32.mrf.mxu1 }
  0xf6   : > { %v1000_v0 = vadd.f32 %v999_v59, %v969_v57  ;;  %v931_v1 = vadd.f32 %v1440_v43, %v930_v58  ;;  %v971_v6 = vmul.f32 %v571_v61, %v571_v61 }
  0xf7   : > { %v1444_v3 = vpop.f32.mrf.mxu0  ;;  %v1835_v16 = vpop.f32.mrf.mxu1 }
  0xf8   : > { %v932_v5 = vadd.f32 %v931_v1, %v571_v61  ;;  %v1001_v7 = vadd.f32 %v1000_v0, %v970_v63  ;;  %v1341_v8 = vpack.c.bf16 %v1444_v3, %v1443_v55  ;;  %v1381_v20 = vpack.c.bf16 %v1835_v16, %v1829_v4 }
  0xf9   : > { %v574_v9 = vpop.f32.mrf.mxu0  ;;  %v1840_v22 = vpop.f32.mrf.mxu1  ;;  %v974_v24 = vmul.f32 %v1444_v3, %v1444_v3 }
  0xfa   : > { %v1002_v11 = vadd.f32 %v1001_v7, %v971_v6  ;;  %1397 = vst [vmem:[%s1800_s21 + $0x28] sm:$0xff] %v1341_v8   ;;  %v1336_v12 = vpack.c.bf16 %v574_v9, %v571_v61  ;;  %v933_v13 = vadd.f32 %v932_v5, %v574_v9  ;;  %v972_v14 = vmul.f32 %v574_v9, %v574_v9 }
  0xfb   : > { %v1447_v15 = vpop.f32.mrf.mxu0  ;;  %1405 = vst [vmem:[%s1800_s21 + $0x68] sm:$0xff] %v1381_v20   ;;  %v1376_v28 = vpack.c.bf16 %v1840_v22, %v1832_v10  ;;  %v1845_v30 = vpop.f32.mrf.mxu1 }
  0xfc   : > { %1396 = vst [vmem:[%s1800_s21 + $0x20] sm:$0xff] %v1336_v12   ;;  %v934_v18 = vadd.f32 %v1443_v55, %v933_v13  ;;  %v1003_v19 = vadd.f32 %v1002_v11, %v972_v14  ;;  %v977_v45 = vmul.f32 %v1447_v15, %v1447_v15  ;;  %v979_v55 = vmul.f32 %v1798_v26, %v1798_v26 }
  0xfd   : > { %v587_v21 = vpop.f32.mrf.mxu0  ;;  %1404 = vst [vmem:[%s1800_s21 + $0x60] sm:$0xff] %v1376_v28   ;;  %v1848_v37 = vpop.f32.mrf.mxu1 }
  0xfe   : > { %v1004_v25 = vadd.f32 %v1003_v19, %v973_v17  ;;  %v935_v27 = vadd.f32 %v1444_v3, %v934_v18  ;;  %v975_v33 = vmul.f32 %v587_v21, %v587_v21 }
  0xff   : > { %v1448_v29 = vpop.f32.mrf.mxu0  ;;  %v1853_v43 = vpop.f32.mrf.mxu1 }
 0x100   : > { %v936_v31 = vadd.f32 %v935_v27, %v587_v21  ;;  %v1005_v34 = vadd.f32 %v1004_v25, %v974_v24  ;;  %v1351_v35 = vpack.c.bf16 %v1448_v29, %v1447_v15  ;;  %v1391_v48 = vpack.c.bf16 %v1853_v43, %v1845_v30 }
 0x101   : > { %v590_v36 = vpop.f32.mrf.mxu0  ;;  %v1858_v49 = vpop.f32.mrf.mxu1  ;;  %v978_v51 = vmul.f32 %v1448_v29, %v1448_v29 }
 0x102   : > { %v1006_v39 = vadd.f32 %v1005_v34, %v975_v33  ;;  %1399 = vst [vmem:[%s1800_s21 + $0x38] sm:$0xff] %v1351_v35   ;;  %v1346_v40 = vpack.c.bf16 %v590_v36, %v587_v21  ;;  %v937_v41 = vadd.f32 %v936_v31, %v590_v36  ;;  %v976_v42 = vmul.f32 %v590_v36, %v590_v36 }
 0x103   : > { %1407 = vst [vmem:[%s1800_s21 + $0x78] sm:$0xff] %v1391_v48   ;;  %v1386_v54 = vpack.c.bf16 %v1858_v49, %v1848_v37 }
 0x104   : > { %1398 = vst [vmem:[%s1800_s21 + $0x30] sm:$0xff] %v1346_v40   ;;  %v938_v46 = vadd.f32 %v1447_v15, %v937_v41  ;;  %v1007_v47 = vadd.f32 %v1006_v39, %v976_v42 }
 0x105   : > { %1406 = vst [vmem:[%s1800_s21 + $0x70] sm:$0xff] %v1386_v54  }
 0x106   : > { %v939_v52 = vadd.f32 %v1448_v29, %v938_v46  ;;  %v1008_v53 = vadd.f32 %v1007_v47, %v977_v45 }
 0x108   : > { %v1009_v57 = vadd.f32 %v1008_v53, %v978_v51  ;;  %v940_v58 = vadd.f32 %v939_v52, %v1798_v26 }
 0x109   : > { %1566 = shalt.err (!%p1563_p5)
}
 0x10a   : > { %s1567_s8 = scalar_lea.hbm %s1863_s29, 2048  ;;  %s1571_s19 = scalar_lea.hbm %s1986_s2, 4096 }
 0x10b   : > { %p1568_p6 = scmp.ne.s32.totalorder %s1863_s29, %s1567_s8  ;;  %p1572_p10 = scmp.lt.s32.totalorder %s1863_s29, %s1986_s2 }
 0x10c   : > { %p1573_p11 = scmp.lt.s32.totalorder %s1571_s19, %s1567_s8 }
 0x10d   : > { %p1569_p7 = pnand %p1568_p6, %p1726_p4 }
 0x10e   : > { %p1574_p12 = por %p1573_p11, %p1572_p10 }
 0x10f   : > { %p1570_p9 = pneg %p1569_p7 }
 0x111   : > { %p1575_p13 = pnand %p1574_p12, %p1570_p9 }
 0x113   : > { %1578 = shalt.err (!%p1575_p13)
}
 0x114   : > { %s1663_s27 = smov 64   ;;  %s1664_s28 = smov 4   ;;  %v941_v26 = vadd.f32 %v940_v58, %v1808_v38  ;;  %v980_v59 = vmul.f32 %v1808_v38, %v1808_v38  ;;  %v1010_v60 = vadd.f32 %v1009_v57, %v979_v55  ;;  %v981_v61 = vmul.f32 %v1796_v23, %v1796_v23 }
 0x115   : > { %1471 = dma.vmem_to_hbm [thread:$0]  (%p1726_p4), %s1865_s26, 2048, %s1863_s29, %s1034_s30, %s1663_s27, %s1663_s27, %s1664_s28   ;;  %v982_v1 = vmul.f32 %v1803_v32, %v1803_v32  ;;  %v983_v6 = vmul.f32 %v1816_v50, %v1816_v50  ;;  %v984_v9 = vmul.f32 %v1824_v62, %v1824_v62  ;;  %v987_v15 = vmul.f32 %v1832_v10, %v1832_v10 }
 0x116   : > { %v942_v63 = vadd.f32 %v1796_v23, %v941_v26  ;;  %v1011_v0 = vadd.f32 %v1010_v60, %v980_v59  ;;  %v985_v23 = vmul.f32 %v1813_v44, %v1813_v44  ;;  %v988_v19 = vmul.f32 %v1840_v22, %v1840_v22  ;;  %s1277_s26 = sshll.u32 %s1651_s15, 7  ;;  %s1070_s29 = sshll.u32 %s1792_s18, 4  ;;  %s1071_s29 = int_to_ptr.vmem [resolvable:$true] %s1070_s29 }
 0x117   : > { %v991_v27 = vmul.f32 %v1848_v37, %v1848_v37  ;;  %v992_v31 = vmul.f32 %v1858_v49, %v1858_v49  ;;  %v994_v34 = vmul.f32 %v1853_v43, %v1853_v43  ;;  %s1068_s5 = scalar_lea.hbm %s1987_s3, %s1277_s26  ;;  %s1039_s6 = scalar_lea.sflag [#allocation6], %s1789_s10 }
 0x118   : > { %v1012_v2 = vadd.f32 %v1011_v0, %v981_v61  ;;  %v943_v3 = vadd.f32 %v1803_v32, %v942_v63  ;;  %v986_v32 = vmul.f32 %v1819_v56, %v1819_v56  ;;  %s1579_s7 = scalar_lea.vmem %s1071_s29, 128  ;;  %s1665_s8 = smov [#allocation5]  }
 0x119   : > { %p1580_p0 = scmp.ne.s32.totalorder %s1071_s29, %s1579_s7  ;;  %s1583_s9 = sshll.u32 %s1665_s8, 4  ;;  %s1584_s9 = int_to_ptr.vmem [resolvable:$false] %s1583_s9 }
 0x11a   : > { %v944_v5 = vadd.f32 %v943_v3, %v1816_v50  ;;  %v1013_v7 = vadd.f32 %v1012_v2, %v982_v1  ;;  %s1585_s15 = scalar_lea.vmem %s1584_s9, 256  ;;  %p1586_p3 = scmp.lt.s32.totalorder %s1071_s29, %s1584_s9 }
 0x11b   : > { %p1581_p1 = pnand %p1580_p0, %p1726_p4  ;;  %p1587_p5 = scmp.lt.s32.totalorder %s1585_s15, %s1579_s7 }
 0x11c   : > { %v1014_v38 = vadd.f32 %v1013_v7, %v983_v6  ;;  %v945_v8 = vadd.f32 %v944_v5, %v1824_v62 }
 0x11d   : > { %p1582_p2 = pneg %p1581_p1  ;;  %p1588_p6 = por %p1587_p5, %p1586_p3 }
 0x11e   : > { %v946_v11 = vadd.f32 %v1813_v44, %v945_v8  ;;  %v1015_v12 = vadd.f32 %v1014_v38, %v984_v9  ;;  %v989_v44 = vmul.f32 %v1829_v4, %v1829_v4 }
 0x11f   : > { %p1589_p7 = pnand %p1588_p6, %p1582_p2 }
 0x120   : > { %v1016_v13 = vadd.f32 %v1015_v12, %v985_v23  ;;  %v947_v14 = vadd.f32 %v1819_v56, %v946_v11  ;;  %v990_v56 = vmul.f32 %v1835_v16, %v1835_v16 }
 0x122   : > { %v948_v50 = vadd.f32 %v947_v14, %v1832_v10  ;;  %v1017_v17 = vadd.f32 %v1016_v13, %v986_v32 }
 0x124   : > { %v1018_v18 = vadd.f32 %v1017_v17, %v987_v15  ;;  %v949_v62 = vadd.f32 %v948_v50, %v1840_v22 }
 0x126   : > { %v950_v20 = vadd.f32 %v1829_v4, %v949_v62  ;;  %v1019_v21 = vadd.f32 %v1018_v18, %v988_v19  ;;  %v993_v4 = vmul.f32 %v1845_v30, %v1845_v30 }
 0x128   : > { %v1020_v24 = vadd.f32 %v1019_v21, %v989_v44  ;;  %v951_v25 = vadd.f32 %v1835_v16, %v950_v20 }
 0x12a   : > { %v952_v10 = vadd.f32 %v951_v25, %v1848_v37  ;;  %v1021_v28 = vadd.f32 %v1020_v24, %v990_v56 }
 0x12c   : > { %v1022_v29 = vadd.f32 %v1021_v28, %v991_v27  ;;  %v953_v22 = vadd.f32 %v952_v10, %v1858_v49 }
 0x12e   : > { %v954_v33 = vadd.f32 %v1845_v30, %v953_v22  ;;  %v1023_v16 = vadd.f32 %v1022_v29, %v992_v31 }
 0x130   : > { %v955_v35 = vadd.f32 %v1853_v43, %v954_v33  ;;  %v1024_v36 = vadd.f32 %v1023_v16, %v993_v4 }
 0x132   : > { %v956_v37 = vrot.slane %v955_v35, 4  ;;  %v1025_v39 = vadd.f32 %v1024_v36, %v994_v34 }
 0x134   : > { %v957_v40 = vadd.f32 %v956_v37, %v955_v35  ;;  %v1026_v41 = vrot.slane %v1025_v39, 4 }
 0x136   : > { %v958_v42 = vrot.slane %v957_v40, 2  ;;  %v1027_v45 = vadd.f32 %v1026_v41, %v1025_v39 }
 0x138   : > { %v959_v46 = vadd.f32 %v958_v42, %v957_v40  ;;  %v1028_v30 = vrot.slane %v1027_v45, 2 }
 0x13a   : > { %v960_v47 = vrot.slane %v959_v46, 1  ;;  %v1029_v48 = vadd.f32 %v1028_v30, %v1027_v45 }
 0x13c   : > { %v961_v49 = vadd.f32 %v960_v47, %v959_v46  ;;  %v1030_v51 = vrot.slane %v1029_v48, 1 }
 0x13e   : > { %962 = vst [vmem:[%s1792_s18] sm:$0x1] %v961_v49  ;;  %v1031_v43 = vadd.f32 %v1030_v51, %v1029_v48 }
 0x140   : > { %1032 = vst [vmem:[%s1792_s18 + $0x1] sm:$0x1] %v1031_v43 }
 0x141   : > { %1592 = shalt.err (!%p1589_p7)
}
 0x142   : > { %s1593_s11 = scalar_lea.hbm %s1068_s5, 128  ;;  %s1597_s19 = scalar_lea.hbm %s1987_s3, 256 }
 0x143   : > { %p1594_p9 = scmp.ne.s32.totalorder %s1068_s5, %s1593_s11  ;;  %p1598_p12 = scmp.lt.s32.totalorder %s1068_s5, %s1987_s3 }
 0x144   : > { %p1599_p13 = scmp.lt.s32.totalorder %s1597_s19, %s1593_s11 }
 0x145   : > { %p1595_p10 = pnand %p1594_p9, %p1726_p4 }
 0x146   : > { %p1600_p0 = por %p1599_p13, %p1598_p12 }
 0x147   : > { %p1596_p11 = pneg %p1595_p10 }
 0x149   : > { %p1601_p1 = pnand %p1600_p0, %p1596_p11 }
 0x14b   : > { %1604 = shalt.err (!%p1601_p1)
}
 0x14c   : > { %1472 = dma.vmem_to_hbm [thread:$0]  (%p1726_p4), %s1071_s29, 128, %s1068_s5, %s1039_s6  }
 0x14d PF: > { %p1482_p2 = scmp.ge.s32.totalorder %s1659_s17, 2  ;;  %s1082_s27 = sand.u32 1, %s1639_s12  }
 0x14e   : > { %s1083_s28 = scalar_lea.sflag [#allocation4], %s1082_s27 }
 0x14f   : > { %p1476_p3 = pnand %p1482_p2, %p1733_p8 }
 0x151   : > { %p1477_p5 = pneg %p1476_p3 }
 0x153   : > { %1630 = dma.done.wait (%p1477_p5), %s1083_s28, 2048  }
 0x154   : > { %1632 = vsyncadd (%p1477_p5), %s1083_s28, 4294965248  ;;  %s1092_s26 = scalar_lea.sflag [#allocation6], %s1082_s27 }
 0x155   : > { %1634 = dma.done.wait (%p1477_p5), %s1092_s26, 128  }
 0x156   : > { %1636 = vsyncadd (%p1477_p5), %s1092_s26, 4294967168  ;;  %s20_s17 = sadd.s32 1, %s1659_s17   ;;  %s1990_s12 = smov %s1643_s13 }
 0x157   : > { %p17_p6 = scmp.ge.s32.totalorder %s20_s17, 4   ;;  %s1991_s13 = smov %s1647_s14 }
 0x158   : > { %s1992_s14 = smov %s1739_s25  ;;  %s1993_s15 = smov %s1655_s16 }
 0x159   : > { %s1994_s16 = smov %s1996_s20  ;;  %19 = sbr.rel (!%p17_p6) target bundleno = 6 (0x6), region = 91 }
 0x15e   :  { %1097 = vsyncpa [#allocation4], 1 }
 0x15f   :  { %1099 = vsyncpa [#allocation4 + $0x1], 1 }
 0x160   :  { %1100 = vsyncpa [#allocation6], 1 }
 0x161   :  { %1102 = vsyncpa [#allocation6 + $0x1], 1 }

</bundles_post_ra>
